<compile_context>
chip_gen: v5e
topology: v5e:2x2
jax: 0.10.0
libtpu: 0.0.40
codegen_flags: <defaults>
</compile_context>

<pallas_src>
import numpy as np
import jax
import jax.numpy as jnp
from jax.experimental import pallas as pl
from jax.experimental.pallas import tpu as pltpu


def simpleconv_kernel(adj_ref, feat_ref, w_ref, out_ref, acc_ref):
    """grid = (row_tiles, k_tiles); axis 1 reduces over source nodes."""
    k = pl.program_id(1)

    @pl.when(k == 0)
    def _():
        acc_ref[...] = jnp.zeros_like(acc_ref)

    # acc += A[row_tile, k_tile] @ feat[k_tile, :]   (message aggregation)
    acc_ref[...] += jnp.dot(adj_ref[...], feat_ref[...],
                            preferred_element_type=jnp.float32)

    @pl.when(k == pl.num_programs(1) - 1)
    def _():
        # (A @ feat) @ W == A @ (feat @ W); then ReLU, lane-dense store.
        h = jnp.dot(acc_ref[...], w_ref[...],
                    preferred_element_type=jnp.float32)
        out_ref[...] = jnp.maximum(h, 0.0).astype(out_ref.dtype)


def simple_conv(adj, feat, w, *, tile_rows=None, tile_k=None,
                cast_to_bf16=False):
    """adj: (N, N) normalized dense adjacency, feat: (N, in), w: (in, out)."""
    N, in_feats = feat.shape
    assert adj.shape == (N, N)
    assert w.shape[0] == in_feats
    out_feats = w.shape[1]

    # Lane-dense output / MXU N-dim: pad out_feats up to a multiple of 128.
    out_pad = ((out_feats + 127) // 128) * 128
    w_p = jnp.pad(w.astype(jnp.float32), ((0, 0), (0, out_pad - out_feats)))

    # Tile choice: whole problem in one step when small, otherwise big tiles.
    # TODO(synk): pad N for graph sizes not divisible by the chosen tiles.
    if tile_rows is None:
        tile_rows = N if N <= 256 else 256
    if tile_k is None:
        tile_k = N if N <= 512 else 512
    assert N % tile_rows == 0 and N % tile_k == 0
    # (8, 128) layout constraint on block last-two dims (or full-dim blocks).
    assert tile_rows == N or tile_rows % 8 == 0
    assert tile_k == N or tile_k % 128 == 0

    if cast_to_bf16:
        # Halve HBM traffic / double MXU throughput on v6e/v7x; f32 accumulate.
        adj_c = adj.astype(jnp.bfloat16)
        feat_c = feat.astype(jnp.bfloat16)
    else:
        adj_c = adj.astype(jnp.float32)
        feat_c = feat.astype(jnp.float32)

    in_bytes = 2 if cast_to_bf16 else 4
    cost = pl.CostEstimate(
        flops=int(2 * N * N * in_feats + 2 * N * in_feats * out_pad),
        transcendentals=0,
        bytes_accessed=int(N * N * in_bytes + N * in_feats * in_bytes
                           + in_feats * out_pad * 4 + N * out_pad * 4),
    )

    grid = (N // tile_rows, N // tile_k)
    out = pl.pallas_call(
        simpleconv_kernel,
        out_shape=jax.ShapeDtypeStruct((N, out_pad), jnp.float32),
        grid=grid,
        in_specs=[
            # row/k tile of the dense normalized adjacency
            pl.BlockSpec((tile_rows, tile_k), lambda i, k: (i, k)),
            # matching k-slab of node features
            pl.BlockSpec((tile_k, in_feats), lambda i, k: (k, 0)),
            # full (padded) weight matrix, resident every step
            pl.BlockSpec((in_feats, out_pad), lambda i, k: (0, 0)),
        ],
        out_specs=pl.BlockSpec((tile_rows, out_pad), lambda i, k: (i, 0)),
        scratch_shapes=[pltpu.VMEM((tile_rows, in_feats), jnp.float32)],
        compiler_params=pltpu.CompilerParams(
            dimension_semantics=("parallel", "arbitrary"),
            vmem_limit_bytes=64 * 1024 * 1024),
        cost_estimate=cost,
    )(adj_c, feat_c, w_p)

    return out[:, :out_feats]


def build_normalized_adj(key, n):
    """Deterministic small random graph -> dense sym-normalized A (pre_adj)."""
    bern = jax.random.bernoulli(key, p=0.15, shape=(n, n)).astype(jnp.float32)
    a = jnp.triu(bern, k=1)
    a = a + a.T                                   # undirected
    a_hat = a + jnp.eye(n, dtype=jnp.float32)     # A + I
    rowsum = a_hat.sum(axis=1)
    d_inv_sqrt = jnp.where(rowsum > 0, rowsum ** -0.5, 0.0)
    return a_hat * d_inv_sqrt[:, None] * d_inv_sqrt[None, :]


if __name__ == "__main__":
    N, IN_FEATS, OUT_FEATS = 64, 32, 16

    key = jax.random.PRNGKey(0)
    k_adj, k_feat, k_w = jax.random.split(key, 3)

    adj = build_normalized_adj(k_adj, N)                          # (N, N)
    feat = jax.random.normal(k_feat, (N, IN_FEATS), jnp.float32)  # (N, in)
    # nn.Parameter(torch.randn(in_feats, out_feats)) -> deterministic normal
    w = jax.random.normal(k_w, (IN_FEATS, OUT_FEATS), jnp.float32)

    out = jax.block_until_ready(simple_conv(adj, feat, w))

    # Reference = original association adj @ (feat @ W), ReLU.  The kernel
    # reassociates to (adj @ feat) @ W and the MXU f32 path may use reduced-
    # precision passes, so compare with a modest tolerance (still far below
    # any structural-bug scale).
    ref = jnp.maximum(adj @ (feat @ w), 0.0)
    np.testing.assert_allclose(np.asarray(out), np.asarray(ref),
                               rtol=2e-2, atol=2e-2)

    # bf16-MXU-input variant (the v6e/v7x fast path); loose bf16 tolerance.
    out_bf16 = jax.block_until_ready(simple_conv(adj, feat, w,
                                                 cast_to_bf16=True))
    np.testing.assert_allclose(np.asarray(out_bf16), np.asarray(ref),
                               rtol=1e-1, atol=1e-1)

    print("KERNEL_OK")
</pallas_src>

<mosaic_0001>
module attributes {stable_mosaic.version = 11 : i64} {
  func.func @simpleconv_kernel(%arg0: i32, %arg1: i32, %arg2: memref<64x64xf32, #tpu.memory_space<vmem>>, %arg3: memref<64x32xf32, #tpu.memory_space<vmem>>, %arg4: memref<32x128xf32, #tpu.memory_space<vmem>>, %arg5: memref<64x128xf32, #tpu.memory_space<vmem>>, %arg6: memref<64x32xf32, #tpu.memory_space<vmem>>) attributes {dimension_semantics = [#tpu.dimension_semantics<parallel>, #tpu.dimension_semantics<arbitrary>], iteration_bounds = array<i64: 1, 1>, scalar_prefetch = 0 : i64, scratch_operands = 1 : i64, tpu.core_type = #tpu.core_type<tc>, window_params = [{transform_indices = @transform_0, window_bounds = array<i64: 64, 64>}, {transform_indices = @transform_1, window_bounds = array<i64: 64, 32>}, {pipeline_mode = #tpu.pipeline_mode<synchronous>, transform_indices = @transform_2, window_bounds = array<i64: 32, 128>}, {transform_indices = @transform_3, window_bounds = array<i64: 64, 128>}]} {
    %c0_i32 = arith.constant 0 : i32
    %0 = arith.cmpi eq, %arg1, %c0_i32 : i32
    %1 = arith.extui %0 : i1 to i32
    %c0_i32_0 = arith.constant 0 : i32
    %2 = arith.cmpi ne, %1, %c0_i32_0 : i32
    scf.if %2 {
      %cst_10 = arith.constant 0.000000e+00 : f32
      %12 = vector.broadcast %cst_10 : f32 to vector<64x32xf32>
      %c0_11 = arith.constant 0 : index
      %c0_12 = arith.constant 0 : index
      %13 = vector.load %arg6[%c0_11, %c0_12] : memref<64x32xf32, #tpu.memory_space<vmem>>, vector<64x32xf32>
      tpu.vector_store %arg6[%c0_11, %c0_12], %12 {strides = array<i32>} : memref<64x32xf32, #tpu.memory_space<vmem>>, vector<64x32xf32>,
    } else {
    }
    %c0 = arith.constant 0 : index
    %c0_1 = arith.constant 0 : index
    %3 = vector.load %arg6[%c0, %c0_1] : memref<64x32xf32, #tpu.memory_space<vmem>>, vector<64x32xf32>
    %c0_2 = arith.constant 0 : index
    %c0_3 = arith.constant 0 : index
    %4 = vector.load %arg2[%c0_2, %c0_3] : memref<64x64xf32, #tpu.memory_space<vmem>>, vector<64x64xf32>
    %c0_4 = arith.constant 0 : index
    %c0_5 = arith.constant 0 : index
    %5 = vector.load %arg3[%c0_4, %c0_5] : memref<64x32xf32, #tpu.memory_space<vmem>>, vector<64x32xf32>
    %cst = arith.constant dense<0.000000e+00> : vector<64x32xf32>
    %6 = tpu.matmul %4, %5, %cst {dimension_numbers = #tpu.dot_dimension_numbers<[1], [0], [0], [1], [0, 0, 1, 1], [], []>} : vector<64x64xf32>, vector<64x32xf32>, vector<64x32xf32> -> vector<64x32xf32>
    %7 = arith.addf %3, %6 : vector<64x32xf32>
    %c0_6 = arith.constant 0 : index
    %c0_7 = arith.constant 0 : index
    %8 = vector.load %arg6[%c0_6, %c0_7] : memref<64x32xf32, #tpu.memory_space<vmem>>, vector<64x32xf32>
    tpu.vector_store %arg6[%c0_6, %c0_7], %7 {strides = array<i32>} : memref<64x32xf32, #tpu.memory_space<vmem>>, vector<64x32xf32>,
    %c0_i32_8 = arith.constant 0 : i32
    %9 = arith.cmpi eq, %arg1, %c0_i32_8 : i32
    %10 = arith.extui %9 : i1 to i32
    %c0_i32_9 = arith.constant 0 : i32
    %11 = arith.cmpi ne, %10, %c0_i32_9 : i32
    scf.if %11 {
      %c0_10 = arith.constant 0 : index
      %c0_11 = arith.constant 0 : index
      %12 = vector.load %arg6[%c0_10, %c0_11] : memref<64x32xf32, #tpu.memory_space<vmem>>, vector<64x32xf32>
      %c0_12 = arith.constant 0 : index
      %c0_13 = arith.constant 0 : index
      %13 = vector.load %arg4[%c0_12, %c0_13] : memref<32x128xf32, #tpu.memory_space<vmem>>, vector<32x128xf32>
      %cst_14 = arith.constant dense<0.000000e+00> : vector<64x128xf32>
      %14 = tpu.matmul %12, %13, %cst_14 {dimension_numbers = #tpu.dot_dimension_numbers<[1], [0], [0], [1], [0, 0, 1, 1], [], []>} : vector<64x32xf32>, vector<32x128xf32>, vector<64x128xf32> -> vector<64x128xf32>
      %cst_15 = arith.constant 0.000000e+00 : f32
      %15 = vector.broadcast %cst_15 : f32 to vector<64x128xf32>
      %16 = arith.maximumf %14, %15 : vector<64x128xf32>
      %c0_16 = arith.constant 0 : index
      %c0_17 = arith.constant 0 : index
      %17 = vector.load %arg5[%c0_16, %c0_17] : memref<64x128xf32, #tpu.memory_space<vmem>>, vector<64x128xf32>
      tpu.vector_store %arg5[%c0_16, %c0_17], %16 {strides = array<i32>} : memref<64x128xf32, #tpu.memory_space<vmem>>, vector<64x128xf32>,
    } else {
    }
    return
  }
  func.func @transform_0(%arg0: i32, %arg1: i32) -> (i32, i32) {
    %c0_i32 = arith.constant 0 : i32
    return %arg0, %arg1 : i32, i32
  }
  func.func @transform_1(%arg0: i32, %arg1: i32) -> (i32, i32) {
    %c0_i32 = arith.constant 0 : i32
    %c0_i32_0 = arith.constant 0 : i32
    return %arg1, %c0_i32 : i32, i32
  }
  func.func @transform_2(%arg0: i32, %arg1: i32) -> (i32, i32) {
    %c0_i32 = arith.constant 0 : i32
    %c0_i32_0 = arith.constant 0 : i32
    %c0_i32_1 = arith.constant 0 : i32
    return %c0_i32, %c0_i32_0 : i32, i32
  }
  func.func @transform_3(%arg0: i32, %arg1: i32) -> (i32, i32) {
    %c0_i32 = arith.constant 0 : i32
    %c0_i32_0 = arith.constant 0 : i32
    return %arg0, %c0_i32 : i32, i32
  }
}

</mosaic_0001>

<bundles_post_ra>
// kernel: tpu_custom_call.1
= control target key start
LH: loop header
LB: loop body
LE: loop exit
PB: predicated region body
PF: predicated region fallthrough
CT: control target
= control target key end

     0   :  { %s426_s0 = inlined_call_operand.vmem [shape: f32[64,64], index: 0, kind: input, shape index: {}]   ;;  %s427_s1 = inlined_call_operand.vmem [shape: f32[64,32], index: 1, kind: input, shape index: {}]   ;;  %s428_s2 = inlined_call_operand.vmem [shape: f32[32,128], index: 2, kind: input, shape index: {}]   ;;  %s429_s3 = inlined_call_operand.hbm [shape: f32[64,128], index: 3, kind: output, shape index: {}]  }
   0x1   :  { %v51_v0 = vld [vmem:[%s427_s1 + $0x38] sm:$0xff]  ;;  %v50_v1 = vld [vmem:[%s427_s1 + $0x30] sm:$0xff]  ;;  %v49_v2 = vld [vmem:[%s427_s1 + $0x28] sm:$0xff] }
   0x2   :  { %85 = vmatpush.msra.mxu0 %v51_v0  ;;  %265 = vmatpush.msra.mxu2 %v51_v0  ;;  %v48_v3 = vld [vmem:[%s427_s1 + $0x20] sm:$0xff] }
   0x4   :  { %86 = vmatpush.msra.mxu0 %v50_v1  ;;  %266 = vmatpush.msra.mxu2 %v50_v1 }
   0x6   :  { %87 = vmatpush.msra.mxu0 %v49_v2  ;;  %267 = vmatpush.msra.mxu2 %v49_v2 }
   0x7   :  { %8 = vsyncpa [#allocation4], 0  ;;  %v47_v4 = vld [vmem:[%s427_s1 + $0x18] sm:$0xff]  ;;  %v46_v5 = vld [vmem:[%s427_s1 + $0x10] sm:$0xff]  ;;  %vm19_vm0 = vcmask 261120   ;;  %v307_v6 = vmov 0.0  }
   0x8   :  { %88 = vmatpush.msra.mxu0 %v48_v3  ;;  %268 = vmatpush.msra.mxu2 %v48_v3  ;;  %20 = vst.msk [vmem:[#allocation2] sm:$0xff] %vm19_vm0, %v307_v6  ;;  %v45_v7 = vld [vmem:[%s427_s1 + $0x8] sm:$0xff]  ;;  %v44_v8 = vld [vmem:[%s427_s1] sm:$0xff]  ;;  %vm52_vm1 = vcmask 523264   ;;  %v38_v13 = vld [vmem:[%s426_s0 + $0x10] sm:$0xff]  ;;  %s237_s26 = sshll.u32 %s429_s3, 4  ;;  %s238_s26 = int_to_ptr.hbm [resolvable:$true] %s237_s26 }
   0x9   :  { %21 = vst.msk [vmem:[#allocation2 + $0x8] sm:$0xff] %vm19_vm0, %v307_v6  ;;  %v36_v9 = vld [vmem:[%s426_s0] sm:$0xff]  ;;  %v37_v11 = vld [vmem:[%s426_s0 + $0x8] sm:$0xff]  ;;  %v42_v14 = vld [vmem:[%s426_s0 + $0x30] sm:$0xff]  ;;  %s309_s27 = smov 128   ;;  %s310_s28 = smov 8  }
   0xa   :  { %89 = vmatpush.msra.mxu0 %v47_v4  ;;  %269 = vmatpush.msra.mxu2 %v47_v4  ;;  %22 = vst.msk [vmem:[#allocation2 + $0x10] sm:$0xff] %vm19_vm0, %v307_v6  ;;  %v40_v10 = vld [vmem:[%s426_s0 + $0x20] sm:$0xff]  ;;  %v41_v12 = vld [vmem:[%s426_s0 + $0x28] sm:$0xff]  ;;  %v39_v15 = vld [vmem:[%s426_s0 + $0x18] sm:$0xff] }
   0xb   :  { %23 = vst.msk [vmem:[#allocation2 + $0x18] sm:$0xff] %vm19_vm0, %v307_v6  ;;  %v43_v16 = vld [vmem:[%s426_s0 + $0x38] sm:$0xff]  ;;  %v148_v18 = vld [vmem:[%s428_s2 + $0x10] sm:$0xff]  ;;  %v147_v19 = vld [vmem:[%s428_s2 + $0x8] sm:$0xff] }
   0xc   :  { %90 = vmatpush.msra.mxu0 %v46_v5  ;;  %270 = vmatpush.msra.mxu2 %v46_v5  ;;  %24 = vst.msk [vmem:[#allocation2 + $0x20] sm:$0xff] %vm19_vm0, %v307_v6  ;;  %v149_v17 = vld [vmem:[%s428_s2 + $0x18] sm:$0xff]  ;;  %v146_v20 = vld [vmem:[%s428_s2] sm:$0xff]  ;;  %s308_s2 = smov [#allocation3]  }
   0xd   :  { %25 = vst.msk [vmem:[#allocation2 + $0x28] sm:$0xff] %vm19_vm0, %v307_v6  ;;  %186 = vmatpush.msra.mxu1 %v149_v17  ;;  %273 = vmatpush.msra.mxu3 %v149_v17  ;;  %s235_s23 = sshll.u32 %s308_s2, 4  ;;  %s236_s23 = int_to_ptr.vmem [resolvable:$true] %s235_s23 }
   0xe   :  { %91 = vmatpush.msra.mxu0 %v45_v7  ;;  %271 = vmatpush.msra.mxu2 %v45_v7  ;;  %26 = vst.msk [vmem:[#allocation2 + $0x30] sm:$0xff] %vm19_vm0, %v307_v6 }
   0xf   :  { %27 = vst.msk [vmem:[#allocation2 + $0x38] sm:$0xff] %vm19_vm0, %v307_v6  ;;  %187 = vmatpush.msra.mxu1 %v148_v18  ;;  %274 = vmatpush.msra.mxu3 %v148_v18  ;;  %v28_v21 = vld [vmem:[#allocation2] sm:$0xff] }
  0x10   :  { %92 = vmatpush.msra.mxu0 %v44_v8  ;;  %272 = vmatpush.msra.mxu2 %v44_v8  ;;  %v29_v26 = vld [vmem:[#allocation2 + $0x8] sm:$0xff] }
  0x11   :  { %249 = vmatmul.msk.f32.vlgmr.msra.gmra.mxu0 %vm52_vm1, %v36_v9  ;;  %253 = vmatmul.msk.f32.vlgmr.msra.gmra.mxu2 %vm52_vm1, %v40_v10  ;;  %v30_v33 = vld [vmem:[#allocation2 + $0x10] sm:$0xff] }
  0x12   :  { %188 = vmatpush.msra.mxu1 %v147_v19  ;;  %275 = vmatpush.msra.mxu3 %v147_v19  ;;  %v31_v40 = vld [vmem:[#allocation2 + $0x18] sm:$0xff] }
  0x13   :  { %v32_v24 = vld [vmem:[#allocation2 + $0x20] sm:$0xff] }
  0x14   :  { %189 = vmatpush.msra.mxu1 %v146_v20  ;;  %276 = vmatpush.msra.mxu3 %v146_v20  ;;  %v33_v31 = vld [vmem:[#allocation2 + $0x28] sm:$0xff] }
  0x15   :  { %v34_v38 = vld [vmem:[#allocation2 + $0x30] sm:$0xff] }
  0x16   :  { %v35_v46 = vld [vmem:[#allocation2 + $0x38] sm:$0xff] }
  0x19   :  { %250 = vmatmul.msk.f32.gmra.mxu0 %vm52_vm1, %v37_v11  ;;  %254 = vmatmul.msk.f32.gmra.mxu2 %vm52_vm1, %v41_v12 }
  0x21   :  { %251 = vmatmul.msk.f32.gmra.mxu0 %vm52_vm1, %v38_v13  ;;  %255 = vmatmul.msk.f32.gmra.mxu2 %vm52_vm1, %v42_v14 }
  0x29   :  { %252 = vmatmul.msk.f32.gmra.mxu0 %vm52_vm1, %v39_v15  ;;  %256 = vmatmul.msk.f32.gmra.mxu2 %vm52_vm1, %v43_v16 }
  0x8e   :  { %v94_v22 = vpop.f32.mrf.mxu0 }
  0x8f   :  { %v118_v23 = vadd.f32 %v94_v22, %v28_v21 }
  0x91   :  { %127 = vst.msk [vmem:[#allocation2] sm:$0xff] %vm19_vm0, %v118_v23 }
  0x94   :  { %v106_v25 = vpop.f32.mrf.mxu2 }
  0x95   :  { %v122_v27 = vadd.f32 %v106_v25, %v32_v24 }
  0x96   :  { %v97_v28 = vpop.f32.mrf.mxu0 }
  0x97   :  { %131 = vst.msk [vmem:[#allocation2 + $0x20] sm:$0xff] %vm19_vm0, %v122_v27  ;;  %v119_v29 = vadd.f32 %v97_v28, %v29_v26 }
  0x98   :  { %v138_v30 = vld [vmem:[#allocation2] sm:$0xff] }
  0x99   :  { %128 = vst.msk [vmem:[#allocation2 + $0x8] sm:$0xff] %vm19_vm0, %v119_v29  ;;  %257 = vmatmul.msk.f32.vlgmr.msra.gmra.mxu1 %vm19_vm0, %v138_v30 }
  0x9c   :  { %v109_v32 = vpop.f32.mrf.mxu2 }
  0x9d   :  { %v123_v34 = vadd.f32 %v109_v32, %v33_v31 }
  0x9e   :  { %v100_v35 = vpop.f32.mrf.mxu0  ;;  %v142_v52 = vld [vmem:[#allocation2 + $0x20] sm:$0xff] }
  0x9f   :  { %132 = vst.msk [vmem:[#allocation2 + $0x28] sm:$0xff] %vm19_vm0, %v123_v34  ;;  %v120_v36 = vadd.f32 %v100_v35, %v30_v33 }
  0xa0   :  { %v139_v37 = vld [vmem:[#allocation2 + $0x8] sm:$0xff] }
  0xa1   :  { %129 = vst.msk [vmem:[#allocation2 + $0x10] sm:$0xff] %vm19_vm0, %v120_v36  ;;  %258 = vmatmul.msk.f32.gmra.mxu1 %vm19_vm0, %v139_v37 }
  0xa4   :  { %v112_v39 = vpop.f32.mrf.mxu2 }
  0xa5   :  { %v124_v41 = vadd.f32 %v112_v39, %v34_v38 }
  0xa6   :  { %v103_v42 = vpop.f32.mrf.mxu0  ;;  %v143_v43 = vld [vmem:[#allocation2 + $0x28] sm:$0xff] }
  0xa7   :  { %133 = vst.msk [vmem:[#allocation2 + $0x30] sm:$0xff] %vm19_vm0, %v124_v41  ;;  %v121_v44 = vadd.f32 %v103_v42, %v31_v40  ;;  %262 = vmatmul.msk.f32.vlgmr.msra.gmra.mxu3 %vm19_vm0, %v143_v43 }
  0xa8   :  { %v140_v45 = vld [vmem:[#allocation2 + $0x10] sm:$0xff] }
  0xa9   :  { %130 = vst.msk [vmem:[#allocation2 + $0x18] sm:$0xff] %vm19_vm0, %v121_v44  ;;  %259 = vmatmul.msk.f32.gmra.mxu1 %vm19_vm0, %v140_v45 }
  0xac   :  { %v115_v47 = vpop.f32.mrf.mxu2 }
  0xad   :  { %v125_v48 = vadd.f32 %v115_v47, %v35_v46 }
  0xae   :  { %v144_v49 = vld [vmem:[#allocation2 + $0x30] sm:$0xff] }
  0xaf   :  { %134 = vst.msk [vmem:[#allocation2 + $0x38] sm:$0xff] %vm19_vm0, %v125_v48  ;;  %263 = vmatmul.msk.f32.gmra.mxu3 %vm19_vm0, %v144_v49 }
  0xb0   :  { %v141_v50 = vld [vmem:[#allocation2 + $0x18] sm:$0xff] }
  0xb1   :  { %260 = vmatmul.msk.f32.gmra.mxu1 %vm19_vm0, %v141_v50 }
  0xb6   :  { %v145_v51 = vld [vmem:[#allocation2 + $0x38] sm:$0xff] }
  0xb7   :  { %264 = vmatmul.msk.f32.gmra.mxu3 %vm19_vm0, %v145_v51 }
  0xb9   :  { %261 = vmatmul.msk.f32.gmra.mxu1 %vm19_vm0, %v142_v52 }
 0x116   :  { %v191_v53 = vpop.f32.mrf.mxu1 }
 0x117   :  { %v215_v54 = vmax.f32 %v191_v53, 0.0 }
 0x119   :  { %223 = vst [vmem:[#allocation3] sm:$0xff] %v215_v54 }
 0x11e   :  { %v194_v55 = vpop.f32.mrf.mxu1 }
 0x11f   :  { %v216_v56 = vmax.f32 %v194_v55, 0.0 }
 0x121   :  { %224 = vst [vmem:[#allocation3 + $0x8] sm:$0xff] %v216_v56 }
 0x126   :  { %v197_v57 = vpop.f32.mrf.mxu1 }
 0x127   :  { %v217_v58 = vmax.f32 %v197_v57, 0.0 }
 0x129   :  { %225 = vst [vmem:[#allocation3 + $0x10] sm:$0xff] %v217_v58 }
 0x12a   :  { %v206_v59 = vpop.f32.mrf.mxu3 }
 0x12b   :  { %v220_v60 = vmax.f32 %v206_v59, 0.0 }
 0x12d   :  { %228 = vst [vmem:[#allocation3 + $0x28] sm:$0xff] %v220_v60 }
 0x12e   :  { %v200_v61 = vpop.f32.mrf.mxu1 }
 0x12f   :  { %v218_v62 = vmax.f32 %v200_v61, 0.0 }
 0x131   :  { %226 = vst [vmem:[#allocation3 + $0x18] sm:$0xff] %v218_v62 }
 0x132   :  { %v209_v63 = vpop.f32.mrf.mxu3 }
 0x133   :  { %v221_v0 = vmax.f32 %v209_v63, 0.0 }
 0x135   :  { %229 = vst [vmem:[#allocation3 + $0x30] sm:$0xff] %v221_v0 }
 0x136   :  { %v203_v1 = vpop.f32.mrf.mxu1 }
 0x137   :  { %v219_v2 = vmax.f32 %v203_v1, 0.0 }
 0x139   :  { %227 = vst [vmem:[#allocation3 + $0x20] sm:$0xff] %v219_v2 }
 0x13a   :  { %v212_v3 = vpop.f32.mrf.mxu3 }
 0x13b   :  { %v222_v4 = vmax.f32 %v212_v3, 0.0 }
 0x13d   :  { %230 = vst [vmem:[#allocation3 + $0x38] sm:$0xff] %v222_v4 }
 0x13e   :  { %243 = dma.vmem_to_hbm [thread:$0]  %s236_s23, 1024, %s238_s26, [#allocation4], %s309_s27, %s309_s27, %s310_s28  }
 0x13f   :  { %305 = dma.done.wait [#allocation4], 1024  }
 0x140   :  { %306 = vsyncadd [#allocation4], 4294966272 }
 0x141   :  { %248 = vsyncpa [#allocation4], 1 }

</bundles_post_ra>
